<compile_context>
chip_gen: v7x
topology: tpu7x:2x2x1
jax: 0.10.0
libtpu: 0.0.40
codegen_flags: <defaults>
</compile_context>

<pallas_src>
import functools

import jax
import jax.numpy as jnp
from jax.experimental import pallas as pl
from jax.experimental.pallas import tpu as pltpu


def _shortcut_kernel(x_ref, o_ref, *, c, pad, h2, w, w2):
    # x_ref: (tb, c*h2, w)                row-subsampled rows, W in lanes
    # o_ref: (tb, (c + 2*pad)*h2, w2)
    tb = x_ref.shape[0]
    rows = c * h2

    # Tiny 0/1 column-selection matrix, built in-kernel from iota:
    #   sel[p, k] = 1  iff  p == 2*k        (shape (w, w2), a few KB at most)
    p_idx = jax.lax.broadcasted_iota(jnp.int32, (w, w2), 0)
    k_idx = jax.lax.broadcasted_iota(jnp.int32, (w, w2), 1)
    sel = (p_idx == 2 * k_idx).astype(x_ref.dtype)

    # One small MXU matmul picks the even columns of every row:
    #   (tb*c*h2, w) @ (w, w2) -> (tb*c*h2, w2)
    # Each output element is exactly one picked input element -> bit exact.
    x = x_ref[...].reshape(tb * rows, w)
    y = jnp.dot(x, sel, preferred_element_type=jnp.float32)
    y = y.reshape(tb, rows, w2).astype(o_ref.dtype)

    # Direct slab stores (static slices): zero-pad channels, then the data.
    if pad > 0:
        zeros = jnp.zeros((tb, pad * h2, w2), dtype=o_ref.dtype)
        o_ref[:, pl.ds(0, pad * h2), :] = zeros
        o_ref[:, pl.ds((pad + c) * h2, pad * h2), :] = zeros
    o_ref[:, pl.ds(pad * h2, rows), :] = y


def _tile_and_vmem_limit(b, bytes_per_image):
    """Pick the batch tile from the actual VMEM capacity of this generation."""
    try:
        vmem = int(pltpu.get_tpu_info().vmem_capacity_bytes)
    except Exception:  # pragma: no cover - conservative fallback (v7x physical)
        vmem = 64 << 20

    # Per-step tile budget: leave room for double buffering (2x in + 2x out)
    # plus f32 intermediates, well under the scoped limit we request below.
    budget = max(vmem // 8, 1 << 20)
    tb = max(1, min(b, budget // max(bytes_per_image, 1)))

    # Prefer >=4 grid steps when the batch is big enough: gives the pipeline
    # prefetch/compute/writeback overlap and lets v7x's two TensorCores each
    # take >=2 steps.  Do NOT force a split for tiny batches (on single-TC
    # v5e/v6e that would only add per-step overhead).
    if b >= 8 and pl.cdiv(b, tb) < 4:
        tb = pl.cdiv(b, 4)

    vmem_limit = int(min(3 * vmem // 4, 112 << 20))
    return tb, vmem_limit


def lambda_layer(x, planes):
    """Pallas version of LambdaLayer with the ResNet option-A shortcut lambda."""
    b, c, h, w = x.shape
    pad = planes // 4
    h2, w2 = (h + 1) // 2, (w + 1) // 2
    c_out = c + 2 * pad

    # Row ::2 subsample + dim merge in the wrapper: halves the HBM bytes the
    # kernel DMAs and hands the kernel an already-merged (c*h2, w) tile.
    x_rows = x[:, :, ::2, :].reshape(b, c * h2, w)

    itemsize = jnp.dtype(x.dtype).itemsize
    bytes_per_image = (c * h2 * w + c_out * h2 * w2) * itemsize + c * h2 * w2 * 4
    tb, vmem_limit = _tile_and_vmem_limit(b, bytes_per_image)

    kernel = functools.partial(_shortcut_kernel, c=c, pad=pad, h2=h2, w=w, w2=w2)
    out = pl.pallas_call(
        kernel,
        out_shape=jax.ShapeDtypeStruct((b, c_out * h2, w2), x.dtype),
        grid=(pl.cdiv(b, tb),),
        in_specs=[pl.BlockSpec((tb, c * h2, w), lambda i: (i, 0, 0))],
        out_specs=pl.BlockSpec((tb, c_out * h2, w2), lambda i: (i, 0, 0)),
        compiler_params=pltpu.CompilerParams(
            dimension_semantics=("parallel",),
            vmem_limit_bytes=vmem_limit,
        ),
    )(x_rows)
    return out.reshape(b, c_out, h2, w2)


if __name__ == "__main__":
    key = jax.random.PRNGKey(0)
    B, C, H, W = 2, 4, 16, 16
    planes = 8  # pad = planes // 4 = 2 channels each side -> 8 output channels
    x = jax.random.normal(key, (B, C, H, W), dtype=jnp.float32)

    out = jax.block_until_ready(lambda_layer(x, planes))

    # pure-JAX reference of the same lambda
    pad = planes // 4
    ref = jnp.pad(x[:, :, ::2, ::2], ((0, 0), (pad, pad), (0, 0), (0, 0)))

    assert out.shape == (B, C + 2 * pad, H // 2, W // 2), out.shape
    assert out.dtype == x.dtype, out.dtype
    assert jnp.allclose(out, ref, atol=0.0), "mismatch vs reference"
    print("KERNEL_OK")
</pallas_src>

<mosaic_0001>
module attributes {stable_mosaic.version = 11 : i64} {
  func.func @_shortcut_kernel(%arg0: i32, %arg1: memref<2x32x16xf32, #tpu.memory_space<vmem>>, %arg2: memref<2x64x8xf32, #tpu.memory_space<vmem>>) attributes {dimension_semantics = [#tpu.dimension_semantics<parallel>], iteration_bounds = array<i64: 1>, scalar_prefetch = 0 : i64, scratch_operands = 0 : i64, tpu.core_type = #tpu.core_type<tc>, window_params = [{transform_indices = @transform_0, window_bounds = array<i64: 2, 32, 16>}, {transform_indices = @transform_1, window_bounds = array<i64: 2, 64, 8>}]} {
    %0 = tpu.iota {dimensions = array<i32: 0>} : vector<16x8xi32>
    %1 = tpu.iota {dimensions = array<i32: 1>} : vector<16x8xi32>
    %c2_i32 = arith.constant 2 : i32
    %2 = vector.broadcast %c2_i32 : i32 to vector<16x8xi32>
    %3 = arith.muli %2, %1 : vector<16x8xi32>
    %4 = arith.cmpi eq, %0, %3 : vector<16x8xi32>
    %5 = arith.extui %4 : vector<16x8xi1> to vector<16x8xi32>
    %6 = arith.sitofp %5 : vector<16x8xi32> to vector<16x8xf32>
    %c0 = arith.constant 0 : index
    %c0_0 = arith.constant 0 : index
    %c0_1 = arith.constant 0 : index
    %7 = vector.load %arg1[%c0, %c0_0, %c0_1] : memref<2x32x16xf32, #tpu.memory_space<vmem>>, vector<2x32x16xf32>
    %8 = vector.shape_cast %7 : vector<2x32x16xf32> to vector<64x16xf32>
    %cst = arith.constant dense<0.000000e+00> : vector<64x8xf32>
    %9 = tpu.matmul %8, %6, %cst {dimension_numbers = #tpu.dot_dimension_numbers<[1], [0], [0], [1], [0, 0, 1, 1], [], []>} : vector<64x16xf32>, vector<16x8xf32>, vector<64x8xf32> -> vector<64x8xf32>
    %10 = vector.shape_cast %9 : vector<64x8xf32> to vector<2x32x8xf32>
    %cst_2 = arith.constant 0.000000e+00 : f32
    %11 = vector.broadcast %cst_2 : f32 to vector<2x16x8xf32>
    %c0_3 = arith.constant 0 : index
    %c0_4 = arith.constant 0 : index
    %c0_5 = arith.constant 0 : index
    %12 = vector.load %arg2[%c0_3, %c0_4, %c0_5] : memref<2x64x8xf32, #tpu.memory_space<vmem>>, vector<2x16x8xf32>
    tpu.vector_store %arg2[%c0_3, %c0_4, %c0_5], %11 {strides = array<i32>} : memref<2x64x8xf32, #tpu.memory_space<vmem>>, vector<2x16x8xf32>,
    %c0_6 = arith.constant 0 : index
    %c48 = arith.constant 48 : index
    %c0_7 = arith.constant 0 : index
    %13 = vector.load %arg2[%c0_6, %c48, %c0_7] : memref<2x64x8xf32, #tpu.memory_space<vmem>>, vector<2x16x8xf32>
    tpu.vector_store %arg2[%c0_6, %c48, %c0_7], %11 {strides = array<i32>} : memref<2x64x8xf32, #tpu.memory_space<vmem>>, vector<2x16x8xf32>,
    %c0_8 = arith.constant 0 : index
    %c16 = arith.constant 16 : index
    %c0_9 = arith.constant 0 : index
    %14 = vector.load %arg2[%c0_8, %c16, %c0_9] : memref<2x64x8xf32, #tpu.memory_space<vmem>>, vector<2x32x8xf32>
    tpu.vector_store %arg2[%c0_8, %c16, %c0_9], %10 {strides = array<i32>} : memref<2x64x8xf32, #tpu.memory_space<vmem>>, vector<2x32x8xf32>,
    return
  }
  func.func @transform_0(%arg0: i32) -> (i32, i32, i32) {
    %c0_i32 = arith.constant 0 : i32
    %c0_i32_0 = arith.constant 0 : i32
    %c0_i32_1 = arith.constant 0 : i32
    return %arg0, %c0_i32, %c0_i32_0 : i32, i32, i32
  }
  func.func @transform_1(%arg0: i32) -> (i32, i32, i32) {
    %c0_i32 = arith.constant 0 : i32
    %c0_i32_0 = arith.constant 0 : i32
    %c0_i32_1 = arith.constant 0 : i32
    return %arg0, %c0_i32, %c0_i32_0 : i32, i32, i32
  }
}

</mosaic_0001>

<bundles_post_ra>
// kernel: tpu_custom_call.1
= control target key start
LH: loop header
LB: loop body
LE: loop exit
PB: predicated region body
PF: predicated region fallthrough
CT: control target
= control target key end

     0   :  { %v8_v0 = vlaneseq  ;;  %vm28_vm0 = vcmask 130048   ;;  %v225_v7 = vmov 1.0|1.0   ;;  %vm158_vm4 = vcmask 64512   ;;  %s333_s0 = inlined_call_operand.vmem [shape: f32[2,32,16], index: 0, kind: input, shape index: {}]   ;;  %s334_s1 = inlined_call_operand.vmem [shape: f32[2,64,8], index: 1, kind: output, shape index: {}]  }
   0x1   :  { %v20_v1 = vld [vmem:[%s333_s0] sm:$0xff]  ;;  %v21_v8 = vld [vmem:[%s333_s0 + $0x8] sm:$0xff]  ;;  %v22_v10 = vld [vmem:[%s333_s0 + $0x10] sm:$0xff]  ;;  %v226_v14 = vmov 0.0  }
   0x2   :  { %v24_v2 = vld [vmem:[%s333_s0 + $0x20] sm:$0xff]  ;;  %v9_v3 = vshrl.u32 %v8_v0, 7  ;;  %v12_v4 = vand.u32 127, %v8_v0  ;;  %205 = vmatprep.mubr.msk.f32.mxu0 %vm28_vm0, %v20_v1  ;;  %v25_v9 = vld [vmem:[%s333_s0 + $0x28] sm:$0xff]  ;;  %v26_v11 = vld [vmem:[%s333_s0 + $0x30] sm:$0xff]  ;;  %159 = vst.msk [vmem:[%s334_s1] sm:$0xff] %vm158_vm4, %v226_v14 }
   0x3   :  { %211 = vmatprep.mubr.msk.f32.mxu1 %vm28_vm0, %v24_v2  ;;  %v23_v12 = vld [vmem:[%s333_s0 + $0x18] sm:$0xff]  ;;  %160 = vst.msk [vmem:[%s334_s1 + $0x8] sm:$0xff] %vm158_vm4, %v226_v14  ;;  %161 = vst.msk [vmem:[%s334_s1 + $0x40] sm:$0xff] %vm158_vm4, %v226_v14 }
   0x4   :  { %v10_v5 = vadd.s32 8, %v9_v3  ;;  %v13_v6 = vmul.u32 2, %v12_v4  ;;  %v27_v13 = vld [vmem:[%s333_s0 + $0x38] sm:$0xff]  ;;  %162 = vst.msk [vmem:[%s334_s1 + $0x48] sm:$0xff] %vm158_vm4, %v226_v14  ;;  %163 = vst.msk [vmem:[%s334_s1 + $0x30] sm:$0xff] %vm158_vm4, %v226_v14 }
   0x5   :  { %164 = vst.msk [vmem:[%s334_s1 + $0x38] sm:$0xff] %vm158_vm4, %v226_v14  ;;  %165 = vst.msk [vmem:[%s334_s1 + $0x70] sm:$0xff] %vm158_vm4, %v226_v14 }
   0x6   :  { %vm14_vm1 = vcmp.eq.s32.totalorder %v9_v3, %v13_v6  ;;  %vm15_vm2 = vcmp.eq.s32.totalorder %v10_v5, %v13_v6  ;;  %166 = vst.msk [vmem:[%s334_s1 + $0x78] sm:$0xff] %vm158_vm4, %v226_v14 }
   0x7   :  { %vm217_vm3 = vmpackc.low %vm15_vm2, %vm14_vm1 }
   0x8   :  { %218 = vmatprep.subr.msk.bf16.mxu0 %vm217_vm3, %v225_v7  ;;  %221 = vmatprep.subr.msk.bf16.mxu1 %vm217_vm3, %v225_v7 }
   0x9   :  { %220 = vmatpush3.bf16.msk.msra.mxu0 %vm217_vm3, %v225_v7  ;;  %222 = vmatpush3.bf16.msk.msra.mxu1 %vm217_vm3, %v225_v7 }
   0xc   :  { %206 = vmatmul.mubr.msk.f32.vlgmr.msra.gmra.mrb[0].mxu0 %vm28_vm0, %v21_v8  ;;  %212 = vmatmul.mubr.msk.f32.vlgmr.msra.gmra.mrb[0].mxu1 %vm28_vm0, %v25_v9 }
   0xd   :  { %208 = vmatprep.mubr.msk.f32.mxu0 %vm28_vm0, %v22_v10  ;;  %214 = vmatprep.mubr.msk.f32.mxu1 %vm28_vm0, %v26_v11 }
  0x10   :  { %209 = vmatmul.mubr.msk.f32.gmra.mrb[2].mxu0 %vm28_vm0, %v23_v12  ;;  %215 = vmatmul.mubr.msk.f32.gmra.mrb[2].mxu1 %vm28_vm0, %v27_v13 }
  0xdf   :  { %v207_v15 = vpop.f32.mrb[0].mxu0  ;;  %v213_v16 = vpop.f32.mrb[0].mxu1 }
  0xe0   :  { %168 = vst.msk [vmem:[%s334_s1 + $0x18] sm:$0xff] %vm158_vm4, %v207_v15  ;;  %172 = vst.msk [vmem:[%s334_s1 + $0x58] sm:$0xff] %vm158_vm4, %v213_v16  ;;  %v119_v17 = vpop.f32.mrb[1].mxu0  ;;  %v139_v18 = vpop.f32.mrb[1].mxu1 }
  0xe1   :  { %167 = vst.msk [vmem:[%s334_s1 + $0x10] sm:$0xff] %vm158_vm4, %v119_v17  ;;  %171 = vst.msk [vmem:[%s334_s1 + $0x50] sm:$0xff] %vm158_vm4, %v139_v18 }
  0xe3   :  { %v210_v19 = vpop.f32.mrb[2].mxu0  ;;  %v216_v20 = vpop.f32.mrb[2].mxu1 }
  0xe4   :  { %170 = vst.msk [vmem:[%s334_s1 + $0x28] sm:$0xff] %vm158_vm4, %v210_v19  ;;  %174 = vst.msk [vmem:[%s334_s1 + $0x68] sm:$0xff] %vm158_vm4, %v216_v20  ;;  %v129_v21 = vpop.f32.mrb[3].mxu0  ;;  %v149_v22 = vpop.f32.mrb[3].mxu1 }
  0xe5   :  { %169 = vst.msk [vmem:[%s334_s1 + $0x20] sm:$0xff] %vm158_vm4, %v129_v21  ;;  %173 = vst.msk [vmem:[%s334_s1 + $0x60] sm:$0xff] %vm158_vm4, %v149_v22 }

</bundles_post_ra>
